<compile_context>
chip_gen: v7x
topology: tpu7x:2x2x1
jax: 0.10.0
libtpu: 0.0.40
codegen_flags: <defaults>
</compile_context>

<pallas_src>
import jax
import jax.numpy as jnp
from jax.experimental import pallas as pl
from jax.experimental.pallas import tpu as pltpu

# ----------------- config (mirrors LatentDiffusionModel.__init__) -----------
LATENT_DIM = 128          # latent_dim
NUM_TIMESTEPS = 1000      # num_timesteps
OBJECTIVE = "pred_v"      # objective
TIME_EMB_DIM = 32         # time-embedding width of the surrogate denoiser
HIDDEN_DIM = 128          # hidden width of the surrogate denoiser
AUX_DIM = TIME_EMB_DIM + 3  # [temb | sqrt_acp | sqrt_1m_acp | loss_weight]


def _round_up(n, m):
    return ((n + m - 1) // m) * m


# ----------------- beta schedule / registered buffers (plain JAX glue) ------
def linear_beta_schedule(timesteps: int) -> jnp.ndarray:
    scale = 1000.0 / timesteps
    return jnp.linspace(scale * 1e-4, scale * 0.02, timesteps, dtype=jnp.float32)


def make_buffers(num_timesteps: int):
    betas = linear_beta_schedule(num_timesteps)
    alphas = 1.0 - betas
    alphas_cumprod = jnp.cumprod(alphas)
    snr = alphas_cumprod / (1.0 - alphas_cumprod)
    if OBJECTIVE == "pred_v":
        loss_weight = snr / snr          # == 1 everywhere (kept for generality)
    elif OBJECTIVE == "pred_noise":
        loss_weight = snr
    elif OBJECTIVE == "pred_x0":
        loss_weight = snr / (snr + 1.0)
    else:
        raise ValueError(OBJECTIVE)
    return {
        "sqrt_alphas_cumprod": jnp.sqrt(alphas_cumprod).astype(jnp.float32),
        "sqrt_one_minus_alphas_cumprod": jnp.sqrt(1.0 - alphas_cumprod).astype(jnp.float32),
        "loss_weight": loss_weight.astype(jnp.float32),
    }


def sinusoidal_time_emb(t: jnp.ndarray, dim: int) -> jnp.ndarray:
    """Standard sinusoidal timestep embedding, (B,) int -> (B, dim) f32."""
    half = dim // 2
    freqs = jnp.exp(-jnp.log(10000.0) * jnp.arange(half, dtype=jnp.float32) / (half - 1))
    args = t.astype(jnp.float32)[:, None] * freqs[None, :]
    return jnp.concatenate([jnp.sin(args), jnp.cos(args)], axis=-1)


# ----------------- fused p_losses Pallas kernel ------------------------------
def p_losses_kernel(aux_ref, x0_ref, noise_ref,
                    w1x_ref, w1t_ref, b1_ref, w2_ref, b2_ref, loss_ref):
    # aux: (BM, 35) f32 = [temb(32) | sqrt_acp | sqrt_1m_acp | loss_weight]
    aux = aux_ref[...]
    temb = aux[:, 0:TIME_EMB_DIM].astype(jnp.bfloat16)          # (BM, 32) bf16
    a = aux[:, TIME_EMB_DIM:TIME_EMB_DIM + 1]                   # sqrt(acp[t])
    b = aux[:, TIME_EMB_DIM + 1:TIME_EMB_DIM + 2]               # sqrt(1-acp[t])
    lw = aux[:, TIME_EMB_DIM + 2:TIME_EMB_DIM + 3]              # loss_weight[t]

    x0 = x0_ref[...]                    # (BM, D) f32
    noise = noise_ref[...]              # (BM, D) f32  (torch.randn_like equiv.)

    # q_sample: x_t = sqrt(acp[t]) * x0 + sqrt(1 - acp[t]) * noise
    x_t = a * x0 + b * noise

    # TODO(synk): Unet1D is not defined in the reference file; it is replaced
    # by a deterministic time-conditioned 2-layer MLP denoiser whose matmuls
    # run on the MXU in bf16 with f32 accumulation.
    h = (jnp.dot(x_t.astype(jnp.bfloat16), w1x_ref[...],
                 preferred_element_type=jnp.float32)
         + jnp.dot(temb, w1t_ref[...], preferred_element_type=jnp.float32)
         + b1_ref[...])
    h = jax.nn.gelu(h, approximate=True)
    model_out = jnp.dot(h.astype(jnp.bfloat16), w2_ref[...],
                        preferred_element_type=jnp.float32) + b2_ref[...]

    # target = predict_v(x_start, t, noise)
    target = a * noise - b * x0

    # per-example MSE over all non-batch dims, then * loss_weight[t]
    # (padded rows were zero-padded in the wrapper => lw == 0 => contribute 0)
    diff = model_out - target
    per_example = jnp.mean(diff * diff, axis=-1, keepdims=True)   # (BM, 1)
    loss_ref[...] = per_example * lw


def p_losses_pallas(aux, x0, noise, params, block_rows):
    Bp, D = x0.shape
    A = aux.shape[1]
    BM = block_rows
    grid = (Bp // BM,)

    grid_spec = pltpu.PrefetchScalarGridSpec(
        num_scalar_prefetch=0,
        grid=grid,
        in_specs=[
            pl.BlockSpec((BM, A), lambda i: (i, 0)),               # aux tile
            pl.BlockSpec((BM, D), lambda i: (i, 0)),               # x_start tile
            pl.BlockSpec((BM, D), lambda i: (i, 0)),               # noise tile
            pl.BlockSpec((D, HIDDEN_DIM), lambda i: (0, 0)),       # W1x (resident)
            pl.BlockSpec((TIME_EMB_DIM, HIDDEN_DIM), lambda i: (0, 0)),  # W1t
            pl.BlockSpec((1, HIDDEN_DIM), lambda i: (0, 0)),       # b1  (resident)
            pl.BlockSpec((HIDDEN_DIM, D), lambda i: (0, 0)),       # W2  (resident)
            pl.BlockSpec((1, D), lambda i: (0, 0)),                # b2  (resident)
        ],
        out_specs=pl.BlockSpec((BM, 1), lambda i: (i, 0)),
    )
    return pl.pallas_call(
        p_losses_kernel,
        out_shape=jax.ShapeDtypeStruct((Bp, 1), jnp.float32),
        grid_spec=grid_spec,
        compiler_params=pltpu.CompilerParams(
            dimension_semantics=("parallel",)),
    )(aux, x0, noise,
      params["w1x"], params["w1t"], params["b1"], params["w2"], params["b2"])


# ----------------- module-level forward --------------------------------------
def latent_diffusion_forward(x, key, buffers, params, block_rows=1024):
    """x: (B, 1, latent_dim) -> scalar loss (matches LatentDiffusionModel.forward)."""
    B, C, D = x.shape
    assert C == 1 and D == LATENT_DIM, f"seq_length must be {LATENT_DIM}"
    key_t, key_n = jax.random.split(key)
    t = jax.random.randint(key_t, (B,), 0, NUM_TIMESTEPS)
    noise = jax.random.normal(key_n, (B, D), dtype=jnp.float32)   # torch.randn_like

    # extract(buf, t, ...) -> per-example scalars; packed with the raw time
    # embedding into one lane-dense aux input (single small DMA per tile).
    temb = sinusoidal_time_emb(t, TIME_EMB_DIM)                   # (B, 32)
    coefs = jnp.stack(
        [buffers["sqrt_alphas_cumprod"][t],
         buffers["sqrt_one_minus_alphas_cumprod"][t],
         buffers["loss_weight"][t]], axis=-1)                     # (B, 3)
    aux = jnp.concatenate([temb, coefs], axis=-1)                 # (B, 35) f32

    x0 = x.reshape(B, D).astype(jnp.float32)

    # --- batch tiling (static, computed at trace time) -----------------------
    Bp0 = _round_up(B, 8)
    BM = _round_up(max(8, min(int(block_rows), Bp0)), 8)
    # Keep >= 2 grid steps whenever the batch allows it so the "parallel"
    # axis can be sharded across both v7x TensorCores; the extra ~0.35us step
    # is negligible on single-TC v5e/v6e.
    if Bp0 // BM < 2 and Bp0 >= 16:
        BM = _round_up((Bp0 + 1) // 2, 8)
    Bp = _round_up(B, BM)
    pad = Bp - B
    if pad:
        # Zero padding => padded rows carry loss_weight == 0 and therefore
        # contribute exactly 0 to the sum below (no in-kernel masking needed).
        x0 = jnp.pad(x0, ((0, pad), (0, 0)))
        noise = jnp.pad(noise, ((0, pad), (0, 0)))
        aux = jnp.pad(aux, ((0, pad), (0, 0)))

    per_example = p_losses_pallas(aux, x0, noise, params, BM)     # (Bp, 1)
    return jnp.sum(per_example) / B


# ----------------- deterministic parameter init -------------------------------
def init_params(key):
    k1, k2, k3 = jax.random.split(key, 3)
    w1x = (jax.random.normal(k1, (LATENT_DIM, HIDDEN_DIM), jnp.float32)
           / jnp.sqrt(jnp.float32(LATENT_DIM))).astype(jnp.bfloat16)
    w1t = (jax.random.normal(k2, (TIME_EMB_DIM, HIDDEN_DIM), jnp.float32)
           / jnp.sqrt(jnp.float32(TIME_EMB_DIM))).astype(jnp.bfloat16)
    b1 = jnp.zeros((1, HIDDEN_DIM), jnp.float32)
    w2 = (jax.random.normal(k3, (HIDDEN_DIM, LATENT_DIM), jnp.float32)
          / jnp.sqrt(jnp.float32(HIDDEN_DIM))).astype(jnp.bfloat16)
    b2 = jnp.zeros((1, LATENT_DIM), jnp.float32)
    return {"w1x": w1x, "w1t": w1t, "b1": b1, "w2": w2, "b2": b2}


if __name__ == "__main__":
    root = jax.random.PRNGKey(0)
    k_params, k_x, k_fwd = jax.random.split(root, 3)

    buffers = make_buffers(NUM_TIMESTEPS)
    params = init_params(k_params)

    # Small example: B=20 exercises batch padding, the packed aux input,
    # resident weights, and a 2-step "parallel" grid (BM is clamped so the
    # grid has >= 2 steps).
    B = 20
    x = jax.random.normal(k_x, (B, 1, LATENT_DIM), dtype=jnp.float32)

    fwd = jax.jit(latent_diffusion_forward, static_argnames=("block_rows",))
    loss = fwd(x, k_fwd, buffers, params, block_rows=1024)
    jax.block_until_ready(loss)
    assert loss.shape == () and bool(jnp.isfinite(loss))
    print("KERNEL_OK")
</pallas_src>

<mosaic_0001>
module attributes {stable_mosaic.version = 11 : i64} {
  func.func @p_losses_kernel(%arg0: i32, %arg1: memref<16x35xf32, #tpu.memory_space<vmem>>, %arg2: memref<16x128xf32, #tpu.memory_space<vmem>>, %arg3: memref<16x128xf32, #tpu.memory_space<vmem>>, %arg4: memref<128x128xbf16, #tpu.memory_space<vmem>>, %arg5: memref<32x128xbf16, #tpu.memory_space<vmem>>, %arg6: memref<1x128xf32, #tpu.memory_space<vmem>>, %arg7: memref<128x128xbf16, #tpu.memory_space<vmem>>, %arg8: memref<1x128xf32, #tpu.memory_space<vmem>>, %arg9: memref<16x1xf32, #tpu.memory_space<vmem>>) attributes {dimension_semantics = [#tpu.dimension_semantics<parallel>], iteration_bounds = array<i64: 2>, scalar_prefetch = 0 : i64, scratch_operands = 0 : i64, tpu.core_type = #tpu.core_type<tc>, window_params = [{transform_indices = @transform_0, window_bounds = array<i64: 16, 35>}, {transform_indices = @transform_1, window_bounds = array<i64: 16, 128>}, {transform_indices = @transform_2, window_bounds = array<i64: 16, 128>}, {pipeline_mode = #tpu.pipeline_mode<synchronous>, transform_indices = @transform_3, window_bounds = array<i64: 128, 128>}, {pipeline_mode = #tpu.pipeline_mode<synchronous>, transform_indices = @transform_4, window_bounds = array<i64: 32, 128>}, {pipeline_mode = #tpu.pipeline_mode<synchronous>, transform_indices = @transform_5, window_bounds = array<i64: 1, 128>}, {pipeline_mode = #tpu.pipeline_mode<synchronous>, transform_indices = @transform_6, window_bounds = array<i64: 128, 128>}, {pipeline_mode = #tpu.pipeline_mode<synchronous>, transform_indices = @transform_7, window_bounds = array<i64: 1, 128>}, {transform_indices = @transform_8, window_bounds = array<i64: 16, 1>}]} {
    %c0 = arith.constant 0 : index
    %c0_0 = arith.constant 0 : index
    %0 = vector.load %arg1[%c0, %c0_0] : memref<16x35xf32, #tpu.memory_space<vmem>>, vector<16x35xf32>
    %1 = vector.extract_strided_slice %0 {offsets = [0, 0], sizes = [16, 32], strides = [1, 1]} : vector<16x35xf32> to vector<16x32xf32>
    %2 = arith.truncf %1 : vector<16x32xf32> to vector<16x32xbf16>
    %3 = vector.extract_strided_slice %0 {offsets = [0, 32], sizes = [16, 1], strides = [1, 1]} : vector<16x35xf32> to vector<16x1xf32>
    %4 = vector.extract_strided_slice %0 {offsets = [0, 33], sizes = [16, 1], strides = [1, 1]} : vector<16x35xf32> to vector<16x1xf32>
    %5 = vector.extract_strided_slice %0 {offsets = [0, 34], sizes = [16, 1], strides = [1, 1]} : vector<16x35xf32> to vector<16x1xf32>
    %c0_1 = arith.constant 0 : index
    %c0_2 = arith.constant 0 : index
    %6 = vector.load %arg2[%c0_1, %c0_2] : memref<16x128xf32, #tpu.memory_space<vmem>>, vector<16x128xf32>
    %c0_3 = arith.constant 0 : index
    %c0_4 = arith.constant 0 : index
    %7 = vector.load %arg3[%c0_3, %c0_4] : memref<16x128xf32, #tpu.memory_space<vmem>>, vector<16x128xf32>
    %8 = vector.broadcast %3 : vector<16x1xf32> to vector<16x128xf32>
    %9 = arith.mulf %8, %6 : vector<16x128xf32>
    %10 = vector.broadcast %4 : vector<16x1xf32> to vector<16x128xf32>
    %11 = arith.mulf %10, %7 : vector<16x128xf32>
    %12 = arith.addf %9, %11 : vector<16x128xf32>
    %13 = arith.truncf %12 : vector<16x128xf32> to vector<16x128xbf16>
    %c0_5 = arith.constant 0 : index
    %c0_6 = arith.constant 0 : index
    %14 = vector.load %arg4[%c0_5, %c0_6] : memref<128x128xbf16, #tpu.memory_space<vmem>>, vector<128x128xbf16>
    %cst = arith.constant dense<0.000000e+00> : vector<16x128xf32>
    %15 = tpu.matmul %13, %14, %cst {dimension_numbers = #tpu.dot_dimension_numbers<[1], [0], [0], [1], [0, 0, 1, 1], [], []>} : vector<16x128xbf16>, vector<128x128xbf16>, vector<16x128xf32> -> vector<16x128xf32>
    %c0_7 = arith.constant 0 : index
    %c0_8 = arith.constant 0 : index
    %16 = vector.load %arg5[%c0_7, %c0_8] : memref<32x128xbf16, #tpu.memory_space<vmem>>, vector<32x128xbf16>
    %cst_9 = arith.constant dense<0.000000e+00> : vector<16x128xf32>
    %17 = tpu.matmul %2, %16, %cst_9 {dimension_numbers = #tpu.dot_dimension_numbers<[1], [0], [0], [1], [0, 0, 1, 1], [], []>} : vector<16x32xbf16>, vector<32x128xbf16>, vector<16x128xf32> -> vector<16x128xf32>
    %18 = arith.addf %15, %17 : vector<16x128xf32>
    %c0_10 = arith.constant 0 : index
    %c0_11 = arith.constant 0 : index
    %19 = vector.load %arg6[%c0_10, %c0_11] : memref<1x128xf32, #tpu.memory_space<vmem>>, vector<1x128xf32>
    %20 = vector.broadcast %19 : vector<1x128xf32> to vector<16x128xf32>
    %21 = arith.addf %18, %20 : vector<16x128xf32>
    %22 = arith.mulf %21, %21 : vector<16x128xf32>
    %23 = arith.mulf %21, %22 : vector<16x128xf32>
    %cst_12 = arith.constant 4.471500e-02 : f32
    %24 = vector.broadcast %cst_12 : f32 to vector<16x128xf32>
    %25 = arith.mulf %24, %23 : vector<16x128xf32>
    %26 = arith.addf %21, %25 : vector<16x128xf32>
    %cst_13 = arith.constant 0.797884583 : f32
    %27 = vector.broadcast %cst_13 : f32 to vector<16x128xf32>
    %28 = arith.mulf %27, %26 : vector<16x128xf32>
    %29 = math.tanh %28 : vector<16x128xf32>
    %cst_14 = arith.constant 1.000000e+00 : f32
    %30 = vector.broadcast %cst_14 : f32 to vector<16x128xf32>
    %31 = arith.addf %30, %29 : vector<16x128xf32>
    %cst_15 = arith.constant 5.000000e-01 : f32
    %32 = vector.broadcast %cst_15 : f32 to vector<16x128xf32>
    %33 = arith.mulf %32, %31 : vector<16x128xf32>
    %34 = arith.mulf %21, %33 : vector<16x128xf32>
    %35 = arith.truncf %34 : vector<16x128xf32> to vector<16x128xbf16>
    %c0_16 = arith.constant 0 : index
    %c0_17 = arith.constant 0 : index
    %36 = vector.load %arg7[%c0_16, %c0_17] : memref<128x128xbf16, #tpu.memory_space<vmem>>, vector<128x128xbf16>
    %cst_18 = arith.constant dense<0.000000e+00> : vector<16x128xf32>
    %37 = tpu.matmul %35, %36, %cst_18 {dimension_numbers = #tpu.dot_dimension_numbers<[1], [0], [0], [1], [0, 0, 1, 1], [], []>} : vector<16x128xbf16>, vector<128x128xbf16>, vector<16x128xf32> -> vector<16x128xf32>
    %c0_19 = arith.constant 0 : index
    %c0_20 = arith.constant 0 : index
    %38 = vector.load %arg8[%c0_19, %c0_20] : memref<1x128xf32, #tpu.memory_space<vmem>>, vector<1x128xf32>
    %39 = vector.broadcast %38 : vector<1x128xf32> to vector<16x128xf32>
    %40 = arith.addf %37, %39 : vector<16x128xf32>
    %41 = vector.broadcast %3 : vector<16x1xf32> to vector<16x128xf32>
    %42 = arith.mulf %41, %7 : vector<16x128xf32>
    %43 = vector.broadcast %4 : vector<16x1xf32> to vector<16x128xf32>
    %44 = arith.mulf %43, %6 : vector<16x128xf32>
    %45 = arith.subf %42, %44 : vector<16x128xf32>
    %46 = arith.subf %40, %45 : vector<16x128xf32>
    %47 = arith.mulf %46, %46 : vector<16x128xf32>
    %cst_21 = arith.constant dense<0.000000e+00> : vector<16xf32>
    %48 = vector.multi_reduction <add>, %47, %cst_21 [1] : vector<16x128xf32> to vector<16xf32>
    %49 = vector.shape_cast %48 : vector<16xf32> to vector<16x1xf32>
    %cst_22 = arith.constant 1.280000e+02 : f32
    %50 = vector.broadcast %cst_22 : f32 to vector<16x1xf32>
    %51 = arith.divf %49, %50 : vector<16x1xf32>
    %52 = arith.mulf %51, %5 : vector<16x1xf32>
    %c0_23 = arith.constant 0 : index
    %c0_24 = arith.constant 0 : index
    %53 = vector.load %arg9[%c0_23, %c0_24] : memref<16x1xf32, #tpu.memory_space<vmem>>, vector<16x1xf32>
    tpu.vector_store %arg9[%c0_23, %c0_24], %52 {strides = array<i32>} : memref<16x1xf32, #tpu.memory_space<vmem>>, vector<16x1xf32>,
    return
  }
  func.func @transform_0(%arg0: i32) -> (i32, i32) {
    %c0_i32 = arith.constant 0 : i32
    %c0_i32_0 = arith.constant 0 : i32
    return %arg0, %c0_i32 : i32, i32
  }
  func.func @transform_1(%arg0: i32) -> (i32, i32) {
    %c0_i32 = arith.constant 0 : i32
    %c0_i32_0 = arith.constant 0 : i32
    return %arg0, %c0_i32 : i32, i32
  }
  func.func @transform_2(%arg0: i32) -> (i32, i32) {
    %c0_i32 = arith.constant 0 : i32
    %c0_i32_0 = arith.constant 0 : i32
    return %arg0, %c0_i32 : i32, i32
  }
  func.func @transform_3(%arg0: i32) -> (i32, i32) {
    %c0_i32 = arith.constant 0 : i32
    %c0_i32_0 = arith.constant 0 : i32
    %c0_i32_1 = arith.constant 0 : i32
    return %c0_i32, %c0_i32_0 : i32, i32
  }
  func.func @transform_4(%arg0: i32) -> (i32, i32) {
    %c0_i32 = arith.constant 0 : i32
    %c0_i32_0 = arith.constant 0 : i32
    %c0_i32_1 = arith.constant 0 : i32
    return %c0_i32, %c0_i32_0 : i32, i32
  }
  func.func @transform_5(%arg0: i32) -> (i32, i32) {
    %c0_i32 = arith.constant 0 : i32
    %c0_i32_0 = arith.constant 0 : i32
    %c0_i32_1 = arith.constant 0 : i32
    return %c0_i32, %c0_i32_0 : i32, i32
  }
  func.func @transform_6(%arg0: i32) -> (i32, i32) {
    %c0_i32 = arith.constant 0 : i32
    %c0_i32_0 = arith.constant 0 : i32
    %c0_i32_1 = arith.constant 0 : i32
    return %c0_i32, %c0_i32_0 : i32, i32
  }
  func.func @transform_7(%arg0: i32) -> (i32, i32) {
    %c0_i32 = arith.constant 0 : i32
    %c0_i32_0 = arith.constant 0 : i32
    %c0_i32_1 = arith.constant 0 : i32
    return %c0_i32, %c0_i32_0 : i32, i32
  }
  func.func @transform_8(%arg0: i32) -> (i32, i32) {
    %c0_i32 = arith.constant 0 : i32
    %c0_i32_0 = arith.constant 0 : i32
    return %arg0, %c0_i32 : i32, i32
  }
}

</mosaic_0001>

<bundles_post_ra>
// kernel: latent_diffusion_forward.1
= control target key start
LH: loop header
LB: loop body
LE: loop exit
PB: predicated region body
PF: predicated region fallthrough
CT: control target
= control target key end

     0   :  { %s1003_s27 = smov 0   ;;  %s1143_s0 = inlined_call_operand.vmem [shape: f32[32,35], index: 0, kind: input, shape index: {}]   ;;  %s1144_s1 = inlined_call_operand.vmem [shape: f32[32,128], index: 1, kind: input, shape index: {}]   ;;  %s1145_s2 = inlined_call_operand.vmem [shape: f32[32,128], index: 2, kind: input, shape index: {}]   ;;  %s1146_s3 = inlined_call_operand.vmem [shape: bf16[128,128], index: 3, kind: input, shape index: {}]   ;;  %s1147_s4 = inlined_call_operand.vmem [shape: bf16[32,128], index: 4, kind: input, shape index: {}]   ;;  %s1148_s5 = inlined_call_operand.vmem [shape: f32[1,128], index: 5, kind: input, shape index: {}]   ;;  %s1149_s6 = inlined_call_operand.vmem [shape: bf16[128,128], index: 6, kind: input, shape index: {}]   ;;  %s1150_s7 = inlined_call_operand.vmem [shape: f32[1,128], index: 7, kind: input, shape index: {}]   ;;  %s1151_s8 = inlined_call_operand.vmem [shape: f32[32,1], index: 8, kind: output, shape index: {}]  }
   0x1 LB: > { %s802_s28 = sadd.s32 4294967295, %s951_s27   ;;  %p806_p0 = scmp.ge.s32.totalorder %s951_s27, 1  ;;  %s951_s27 = sphi %s1003_s27, %s18_s27  }
   0x2   : > { %p285_p1 = scmp.lt.s32.totalorder %s951_s27, 3 }
   0x4   : > { %p286_p2 = pnand %p806_p0, %p285_p1 }
   0x5   : > { %s807_s29 = sshll.u32 (!%p286_p2), %s802_s28, 1  ;;  %v953_v0 = vmov (!%p286_p2), 33   ;;  %v954_v1 = vmov (!%p286_p2), 32   ;;  %v923_v2 = vld [vmem:[%s1146_s3] sm:$0xff] (!%p286_p2)   ;;  %v955_v3 = vmov (!%p286_p2), 0.0   ;;  %v924_v4 = vld [vmem:[%s1146_s3 + $0x8] sm:$0xff] (!%p286_p2)  }
   0x6   : > { %289 = sbr.rel (%p286_p2) target bundleno = 884 (0x374), region = 52  ;;  %921 = vset.pattern.permute.xlu1 (!%p286_p2), %v953_v0  ;;  %920 = vset.pattern.permute.xlu0 (!%p286_p2), %v954_v1  ;;  %p330_p3 = scmp.lt.s32.totalorder (!%p286_p2), %s807_s29, 3  ;;  %v925_v6 = vld [vmem:[%s1146_s3 + $0x10] sm:$0xff] (!%p286_p2)   ;;  %v929_v7 = vld [vmem:[%s1147_s4] sm:$0xff] (!%p286_p2)   ;;  %v926_v9 = vld [vmem:[%s1146_s3 + $0x18] sm:$0xff] (!%p286_p2)   ;;  %vm956_vm0 = vmmov (!%p286_p2), 0  }
   0x7   : > { %867 = vmatprep.subr.bf16.mxu1 (!%p286_p2), %v955_v3  ;;  %859 = vmatprep.subr.bf16.mxu0 (!%p286_p2), %v955_v3  ;;  %v931_v10 = vld [vmem:[%s1147_s4 + $0x8] sm:$0xff] (!%p286_p2)   ;;  %v927_v12 = vld [vmem:[%s1146_s3 + $0x20] sm:$0xff] (!%p286_p2)   ;;  %vm418_vm1 = vcmask (!%p286_p2), 261120   ;;  %v930_v14 = vld [vmem:[%s1146_s3 + $0x30] sm:$0xff] (!%p286_p2)   ;;  %s957_s18 = smov (!%p286_p2), 94   ;;  %vm719_vm2 = vcmask (!%p286_p2), 7168  }
   0x8   : > { %868 = vmatpush3.bf16.msra.mxu1 (!%p286_p2), %v923_v2  ;;  %860 = vmatpush3.bf16.msra.mxu0 (!%p286_p2), %v929_v7  ;;  %v928_v13 = vld [vmem:[%s1146_s3 + $0x28] sm:$0xff] (!%p286_p2)   ;;  %v932_v15 = vld [vmem:[%s1146_s3 + $0x38] sm:$0xff] (!%p286_p2)   ;;  %v933_v41 = vld [vmem:[%s1149_s6] sm:$0xff] (!%p286_p2)  }
   0x9   : > { %869 = vmatprep.subr.bf16.mxu1 (!%p286_p2), %v955_v3  ;;  %861 = vmatprep.subr.bf16.mxu0 (!%p286_p2), %v955_v3  ;;  %v934_v42 = vld [vmem:[%s1149_s6 + $0x8] sm:$0xff] (!%p286_p2)   ;;  %v935_v43 = vld [vmem:[%s1149_s6 + $0x10] sm:$0xff] (!%p286_p2)   ;;  %v936_v44 = vld [vmem:[%s1149_s6 + $0x18] sm:$0xff] (!%p286_p2)  }
   0xa   : > { %863 = vmatprep.mubr.msk.bf16.mxu0 (!%p286_p2), %vm956_vm0, %v955_v3  ;;  %883 = vmatprep.mubr.msk.bf16.mxu1 (!%p286_p2), %vm956_vm0, %v955_v3  ;;  %v937_v45 = vld [vmem:[%s1149_s6 + $0x20] sm:$0xff] (!%p286_p2)   ;;  %v938_v46 = vld [vmem:[%s1149_s6 + $0x28] sm:$0xff] (!%p286_p2)   ;;  %v939_v47 = vld [vmem:[%s1149_s6 + $0x30] sm:$0xff] (!%p286_p2)  }
   0xb   : > { %v940_v48 = vld [vmem:[%s1149_s6 + $0x38] sm:$0xff] (!%p286_p2)   ;;  %v826_v50 = vld [vmem:[%s1148_s5] ss:$0 sm:$0xff] (!%p286_p2) }
   0xc   : > { %870 = vmatpush3.bf16.msra.mxu1 (!%p286_p2), %v924_v4  ;;  %862 = vmatpush3.bf16.msra.mxu0 (!%p286_p2), %v931_v10 }
   0xd   : > { %s1153_s29 = smov (!%p330_p3, %s807_s29), 3  ;;  %871 = vmatprep.subr.bf16.mxu1 %v955_v3  ;;  %887 = vmatprep.subr.bf16.mxu0 %v955_v3 }
   0xe   : > { %s1020_s12 = sshll.u32 %s1153_s29, 3 }
   0xf   : > { %s333_s15 = scalar_lea.vmem %s1143_s0, %s1020_s12  ;;  %s339_s14 = scalar_lea.vmem %s1144_s1, %s1020_s12 }
  0x10   : > { %v1026_v5 = vld [vmem:[%s333_s15] sm:$0xff]  ;;  %v1036_v8 = vld [vmem:[%s333_s15 + $0x8] sm:$0xff]  ;;  %872 = vmatpush3.bf16.msra.mxu1 %v925_v6  ;;  %s345_s17 = scalar_lea.vmem %s1145_s2, %s1020_s12  ;;  %s351_s21 = scalar_lea.vmem %s1151_s8, %s1020_s12 }
  0x11   : > { %374 = vperm.xlu1 %921, %v1026_v5   ;;  %363 = vperm.xlu0 %920, %v1026_v5   ;;  %v356_v11 = vpack.c.bf16 %v1036_v8, %v1026_v5  ;;  %v357_v16 = vld [vmem:[%s339_s14] sm:$0xff]  ;;  %v358_v22 = vld [vmem:[%s339_s14 + $0x8] sm:$0xff] }
  0x12   : > { %873 = vmatprep.subr.bf16.mxu1 %v955_v3  ;;  %v359_v17 = vld [vmem:[%s345_s17] sm:$0xff]  ;;  %v360_v23 = vld [vmem:[%s345_s17 + $0x8] sm:$0xff] }
  0x13   : > { %864 = vmatmul.mubr.msk.bf16.vlgmr.msra.gmra.mrb[0].mxu0 %vm418_vm1, %v356_v11 }
  0x14   : > { %874 = vmatpush3.bf16.msra.mxu1 %v926_v9  ;;  %903 = vmatprep.mubr.msk.bf16.mxu0 %vm956_vm0, %v955_v3 }
  0x15   : > { %378 = vperm.xlu1 %921, %v1036_v8   ;;  %368 = vperm.xlu0 %920, %v1036_v8  }
  0x16   : > { %875 = vmatprep.subr.bf16.mxu1 %v955_v3  ;;  %888 = vmatpush3.bf16.msra.mxu0 %v933_v41 }
  0x17   : > { %889 = vmatprep.subr.bf16.mxu0 %v955_v3 }
  0x18   : > { %876 = vmatpush3.bf16.msra.mxu1 %v927_v12 }
  0x19   : > { %922 = vset.pattern.permute.xlu0 %v953_v0  ;;  %877 = vmatprep.subr.bf16.mxu1 %v955_v3 }
  0x1a   : > { %890 = vmatpush3.bf16.msra.mxu0 %v934_v42 }
  0x1b   : > { %891 = vmatprep.subr.bf16.mxu0 %v955_v3 }
  0x1c   : > { %878 = vmatpush3.bf16.msra.mxu1 %v928_v13 }
  0x1d   : > { %879 = vmatprep.subr.bf16.mxu1 %v955_v3 }
  0x1e   : > { %892 = vmatpush3.bf16.msra.mxu0 %v935_v43 }
  0x1f   : > { %893 = vmatprep.subr.bf16.mxu0 %v955_v3 }
  0x20   : > { %880 = vmatpush3.bf16.msra.mxu1 %v930_v14 }
  0x21   : > { %881 = vmatprep.subr.bf16.mxu1 %v955_v3 }
  0x22   : > { %894 = vmatpush3.bf16.msra.mxu0 %v936_v44 }
  0x23   : > { %895 = vmatprep.subr.bf16.mxu0 %v955_v3 }
  0x24   : > { %882 = vmatpush3.bf16.msra.mxu1 %v932_v15  ;;  %v827_v15 = vld [vmem:[%s1150_s7] ss:$0 sm:$0xff] }
  0x26   : > { %896 = vmatpush3.bf16.msra.mxu0 %v937_v45 }
  0x27   : > { %897 = vmatprep.subr.bf16.mxu0 %v955_v3 }
  0x2a   : > { %898 = vmatpush3.bf16.msra.mxu0 %v938_v46 }
  0x2b   : > { %899 = vmatprep.subr.bf16.mxu0 %v955_v3 }
  0x2e   : > { %900 = vmatpush3.bf16.msra.mxu0 %v939_v47 }
  0x2f   : > { %901 = vmatprep.subr.bf16.mxu0 %v955_v3 }
  0x32   : > { %902 = vmatpush3.bf16.msra.mxu0 %v940_v48 }
  0x90   : > { %v375_v18 = vpop.permute.xlu1 %374  ;;  %v364_v19 = vpop.permute.xlu0 %363 }
  0x91   : > { %v1079_v20 = vmul.f32 %v375_v18, %v357_v16  ;;  %v1081_v21 = vmul.f32 %v364_v19, %v359_v17  ;;  %v381_v24 = vmul.f32 %v375_v18, %v359_v17  ;;  %v371_v25 = vmul.f32 %v364_v19, %v357_v16 }
  0x93   : > { %v696_v26 = vsub.f32 %v1081_v21, %v1079_v20  ;;  %v383_v33 = vadd.f32 %v381_v24, %v371_v25 }
  0x94   : > { %v379_v27 = vpop.permute.xlu1 %378  ;;  %v369_v28 = vpop.permute.xlu0 %368 }
  0x95   : > { %v382_v29 = vmul.f32 %v379_v27, %v360_v23  ;;  %v1085_v30 = vmul.f32 %v379_v27, %v358_v22  ;;  %v372_v31 = vmul.f32 %v369_v28, %v358_v22  ;;  %v1087_v32 = vmul.f32 %v369_v28, %v360_v23 }
  0x97   : > { %v384_v34 = vadd.f32 %v382_v29, %v372_v31  ;;  %v697_v35 = vsub.f32 %v1087_v32, %v1085_v30 }
  0x99   : > { %v385_v36 = vpack.c.bf16 %v384_v34, %v383_v33 }
  0x9b   : > { %884 = vmatmul.mubr.bf16.vlgmr.msra.gmra.mrb[0].mxu1 %v385_v36 }
  0xe6   : > { %v456_v37 = vpop.f32.mrb[0].mxu0 }
  0xe7   : > { %v865_v38 = vpop.f32.mrb[1].mxu0 }
  0xe8   : > { %v459_v39 = vpop.f32.mrb[2].mxu0 }
  0xe9   : > { %v866_v40 = vpop.f32.mrb[3].mxu0 }
 0x16e   : > { %v545_v49 = vpop.f32.mrb[0].mxu1 }
 0x16f   : > { %v546_v51 = vadd.f32 %v545_v49, %v456_v37  ;;  %v885_v52 = vpop.f32.mrb[1].mxu1 }
 0x170   : > { %v548_v53 = vpop.f32.mrb[2].mxu1 }
 0x171   : > { %v559_v54 = vadd.f32 %v826_v50, %v546_v51  ;;  %v549_v55 = vadd.f32 %v548_v53, %v459_v39  ;;  %v886_v56 = vpop.f32.mrb[3].mxu1 }
 0x173   : > { %v561_v57 = vmul.f32 %v559_v54, %v559_v54  ;;  %v560_v58 = vadd.f32 %v826_v50, %v549_v55 }
 0x175   : > { %v563_v59 = vmul.f32 %v561_v57, %v559_v54  ;;  %v562_v60 = vmul.f32 %v560_v58, %v560_v58 }
 0x177   : > { %v565_v61 = vmul.f32 0.044715, %v563_v59  ;;  %v564_v62 = vmul.f32 %v562_v60, %v560_v58 }
 0x179   : > { %v567_v63 = vadd.f32 %v565_v61, %v559_v54  ;;  %v566_v0 = vmul.f32 0.044715, %v564_v62 }
 0x17b   : > { %v569_v1 = vmul.f32 0.7978846, %v567_v63  ;;  %v568_v2 = vadd.f32 %v566_v0, %v560_v58 }
 0x17d   : > { %941 = vtanh.f32 %v569_v1  ;;  %v570_v3 = vmul.f32 0.7978846, %v568_v2 }
 0x17f   : > { %943 = vtanh.f32 %v570_v3 }
 0x187   : > { %v942_v4 = vpop.eup %941 }
 0x188   : > { %v573_v6 = vadd.f32 1.0, %v942_v4 }
 0x189   : > { %v944_v7 = vpop.eup %943 }
 0x18a   : > { %v574_v9 = vadd.f32 1.0, %v944_v7  ;;  %v575_v10 = vmul.f32 0.5, %v573_v6 }
 0x18c   : > { %v576_v11 = vmul.f32 0.5, %v574_v9  ;;  %v577_v12 = vmul.f32 %v575_v10, %v559_v54 }
 0x18e   : > { %v578_v13 = vmul.f32 %v576_v11, %v560_v58 }
 0x190   : > { %v579_v14 = vpack.c.bf16 %v578_v13, %v577_v12 }
 0x192   : > { %904 = vmatmul.mubr.bf16.vlgmr.msra.gmra.mrb[4].mxu0 %v579_v14 }
 0x265   : > { %v685_v16 = vpop.f32.mrb[4].mxu0 }
 0x266   : > { %v686_v17 = vadd.f32 %v827_v15, %v685_v16  ;;  %v905_v18 = vpop.f32.mrb[5].mxu0 }
 0x267   : > { %v688_v19 = vpop.f32.mrb[6].mxu0 }
 0x268   : > { %v689_v22 = vadd.f32 %v827_v15, %v688_v19  ;;  %v906_v23 = vpop.f32.mrb[7].mxu0  ;;  %v698_v24 = vsub.f32 %v686_v17, %v696_v26 }
 0x26a   : > { %v700_v25 = vmul.f32 %v698_v24, %v698_v24  ;;  %v699_v27 = vsub.f32 %v689_v22, %v697_v35 }
 0x26c   : > { %702 = vadd.xlane.f32.xlu0 %v700_v25  ;;  %v701_v28 = vmul.f32 %v699_v27, %v699_v27 }
 0x26e   : > { %704 = vadd.xlane.f32.xlu1 %v701_v28 }
 0x2f9   : > { %v703_v29 = vpop.xlane.xlu0 %702 }
 0x2fa   : > { %v707_v31 = vmul.f32 0.0078125, %v703_v29 }
 0x2fb   : > { %v705_v33 = vpop.xlane.xlu1 %704 }
 0x2fc   : > { %v709_v34 = vmul.f32 %v707_v31, %v1026_v5  ;;  %v708_v36 = vmul.f32 0.0078125, %v705_v33 }
 0x2fe   : > { %v710_v37 = vmul.f32 %v708_v36, %v1036_v8  ;;  %713 = vrot.lane.b32.xlu0 %v709_v34, %s957_s18 }
 0x300   : > { %715 = vrot.lane.b32.xlu1 %v710_v37, %s957_s18 }
 0x370   : > { %v714_v20 = vpop.permute.xlu0 %713 }
 0x371   : > { %720 = vst.msk [vmem:[%s351_s21] sm:$0xff] %vm719_vm2, %v714_v20 }
 0x372   : > { %v716_v21 = vpop.permute.xlu1 %715 }
 0x373   : > { %721 = vst.msk [vmem:[%s351_s21 + $0x8] sm:$0xff] %vm719_vm2, %v716_v21 }
 0x374 PF: > { %s18_s27 = sadd.s32 1, %s951_s27  }
 0x375   : > { %p15_p4 = scmp.ge.s32.totalorder %s18_s27, 4  }
 0x377   :  { %17 = sbr.rel (!%p15_p4) target bundleno = 1 (0x1), region = 88 }

</bundles_post_ra>
